<compile_context>
chip_gen: v7x
topology: tpu7x:2x2x1
jax: 0.10.0
libtpu: 0.0.40
codegen_flags: <defaults>
</compile_context>

<pallas_src>
import functools

import jax
import jax.numpy as jnp
from jax import lax
from jax.experimental import pallas as pl
from jax.experimental.pallas import tpu as pltpu

NUM_CLASSES = 10
_DEFAULT_BLOCK_B = 32768            # batch-lane tile (columns) per grid step
_VMEM_LIMIT_BYTES = 32 * 1024 * 1024


def _round_up(x, m):
    return (x + m - 1) // m * m


def _he_loss_kernel(params_ref, nvalid_ref, cos_ref, lab_ref, out_ref, acc_ref,
                    *, assume_bounded):
    # params_ref: SMEM (3,)  f32   -> [s, cm, r]
    # nvalid_ref: SMEM (1,)  i32   -> true batch size B (masks the ragged tail)
    # cos_ref:    VMEM (C, bb) native dtype  (class = sublanes, batch = lanes)
    # lab_ref:    VMEM (1, bb) i32
    # out_ref:    VMEM (1, 8, 128) f32  -> per-slice partial sum (splatted)
    # acc_ref:    VMEM (1, bb) f32      -> running per-column loss accumulator
    i = pl.program_id(1)
    blocks_per_slice = pl.num_programs(1)

    @pl.when(i == 0)
    def _init():
        acc_ref[...] = jnp.zeros_like(acc_ref)

    s = params_ref[0]
    cm = params_ref[1]
    r = params_ref[2]

    cos = cos_ref[...].astype(jnp.float32)                       # (C, bb)
    labs = lab_ref[...]                                          # (1, bb)
    C, bb = cos.shape

    # Mask the ragged tail block (global column index >= B).  Boolean where()
    # masking is NaN/Inf safe, so no HBM-side padding pass is needed.
    col0 = (pl.program_id(0) * blocks_per_slice + i) * bb
    col_ids = col0 + lax.broadcasted_iota(jnp.int32, (1, bb), 1)
    valid = col_ids < nvalid_ref[0]                              # (1, bb) bool

    # Boolean one-hot over the class (sublane) axis (no f32 one-hot tensor).
    row_ids = lax.broadcasted_iota(jnp.int32, (C, bb), 0)
    onehot = row_ids == labs                                     # (C, bb) bool

    # logits = (cos - cm * onehot) * s
    logits = jnp.where(onehot, cos - cm, cos) * s                # (C, bb)

    if assume_bounded:
        # |cos| <= 1  =>  logits <= s, exp stays in f32 range; skip the max.
        lse = jnp.log(jnp.sum(jnp.exp(logits), axis=0, keepdims=True))
    else:
        col_max = jnp.max(logits, axis=0, keepdims=True)         # (1, bb)
        lse = col_max + jnp.log(
            jnp.sum(jnp.exp(logits - col_max), axis=0, keepdims=True))

    cos_label = jnp.sum(jnp.where(onehot, cos, 0.0), axis=0, keepdims=True)

    # Per-column loss with CE and likelihood terms fused:
    #   ce   = lse - (cos_label - cm) * s
    #   lkh  = -s * cos_label                         (scaled by r)
    #   loss = sum(ce + r*lkh)/B = sum(lse - s*(1+r)*cos_label + s*cm)/B
    a = s * (1.0 + r)
    b = s * cm
    combined = lse - a * cos_label + b                           # (1, bb)
    acc_ref[...] += jnp.where(valid, combined, 0.0)

    @pl.when(i == blocks_per_slice - 1)
    def _finalize():
        total = jnp.sum(acc_ref[...])                            # slice partial
        out_ref[...] = jnp.broadcast_to(total, out_ref.shape)


def he_loss2_lkh(cosin_theta, labels, s, cm=0.0, r=0.0,
                 block_b=_DEFAULT_BLOCK_B, transposed=False,
                 assume_cosine_bounded=False):
    """Pallas TPU implementation of HELoss2_lkh.forward.  Returns scalar f32.

    transposed=True means cosin_theta is already laid out as (C, B) = (10, B);
    this is the preferred producer layout (no extra HBM transpose pass).
    """
    if transposed:
        C, B = cosin_theta.shape
        cos_t = cosin_theta
    else:
        B, C = cosin_theta.shape
        # TODO(synk): fold this transpose into the upstream projection so the
        # producer emits (C, B) directly and this extra HBM pass disappears.
        cos_t = jnp.transpose(cosin_theta)
    assert C == NUM_CLASSES, "module hard-codes num_classes=10"

    labs = labels.astype(jnp.int32).reshape(1, B)

    # Large lane tile over the batch: a single block when B fits, otherwise a
    # multiple of 128 capped at block_b.
    bb = max(128, _round_up(min(block_b, _round_up(B, 128)), 128))
    n_blocks = pl.cdiv(B, bb)

    # Two "slices" (outer parallel grid axis) so v7x can put one on each
    # TensorCore; fall back to one slice when the block count does not split
    # evenly (keeps every block at least partially in bounds).
    if n_blocks >= 2 and n_blocks % 2 == 0:
        n_slices, bps = 2, n_blocks // 2
    else:
        n_slices, bps = 1, n_blocks

    params = jnp.asarray([s, cm, r], dtype=jnp.float32)
    nvalid = jnp.asarray([B], dtype=jnp.int32)

    kernel = functools.partial(_he_loss_kernel,
                               assume_bounded=assume_cosine_bounded)

    partials = pl.pallas_call(
        kernel,
        out_shape=jax.ShapeDtypeStruct((n_slices, 8, 128), jnp.float32),
        grid=(n_slices, bps),
        in_specs=[
            pl.BlockSpec(memory_space=pltpu.MemorySpace.SMEM),       # params
            pl.BlockSpec(memory_space=pltpu.MemorySpace.SMEM),       # nvalid
            pl.BlockSpec((C, bb), lambda p, i: (0, p * bps + i)),    # cos (C,bb)
            pl.BlockSpec((1, bb), lambda p, i: (0, p * bps + i)),    # labels
        ],
        out_specs=pl.BlockSpec((1, 8, 128), lambda p, i: (p, 0, 0)),
        scratch_shapes=[pltpu.VMEM((1, bb), jnp.float32)],
        compiler_params=pltpu.CompilerParams(
            dimension_semantics=("parallel", "arbitrary"),
            vmem_limit_bytes=_VMEM_LIMIT_BYTES),
    )(params, nvalid, cos_t, labs)

    # Each slice splats its partial sum over its (8, 128) tile; finish here.
    return jnp.sum(partials[:, 0, 0]) / B


def _reference(cosin_theta, labels, s, cm, r):
    """Pure-JAX reference mirroring the PyTorch module."""
    B = cosin_theta.shape[0]
    onehot = jax.nn.one_hot(labels, NUM_CLASSES, dtype=jnp.float32)
    logits = (cosin_theta.astype(jnp.float32) - onehot * cm) * s
    logp = jax.nn.log_softmax(logits, axis=-1)
    cls_loss = -jnp.mean(jnp.sum(logp * onehot, axis=-1))
    neglog_lkh = -jnp.sum(cosin_theta.astype(jnp.float32) * s * onehot) / B
    return cls_loss + r * neglog_lkh


if __name__ == "__main__":
    key = jax.random.PRNGKey(0)
    s, cm, r = 30.0, 0.2, 0.1
    k1, k2, k3, k4 = jax.random.split(key, 4)

    # Test 1: tiny batch -> single (in-kernel masked) block, single slice.
    B1 = 8
    cos1 = jax.random.uniform(k1, (B1, NUM_CLASSES), jnp.float32, -1.0, 1.0)
    lab1 = jax.random.randint(k2, (B1,), 0, NUM_CLASSES, dtype=jnp.int32)
    out1 = jax.block_until_ready(he_loss2_lkh(cos1, lab1, s, cm=cm, r=r))
    ref1 = _reference(cos1, lab1, s, cm, r)
    assert jnp.allclose(out1, ref1, rtol=1e-5, atol=1e-5), (out1, ref1)

    # Test 2: multi-block grid (block_b=128 -> 6 blocks, 2 parallel slices)
    # with a ragged, in-kernel-masked tail block.
    B2 = 700
    cos2 = jax.random.uniform(k3, (B2, NUM_CLASSES), jnp.float32, -1.0, 1.0)
    lab2 = jax.random.randint(k4, (B2,), 0, NUM_CLASSES, dtype=jnp.int32)
    out2 = jax.block_until_ready(
        he_loss2_lkh(cos2, lab2, s, cm=cm, r=r, block_b=128))
    ref2 = _reference(cos2, lab2, s, cm, r)
    assert jnp.allclose(out2, ref2, rtol=1e-5, atol=1e-5), (out2, ref2)

    # Test 3: preferred pre-transposed (C, B) producer layout + bounded-cosine
    # fast path (skips the per-column max reduce).
    out3 = jax.block_until_ready(
        he_loss2_lkh(jnp.transpose(cos1), lab1, s, cm=cm, r=r,
                     transposed=True, assume_cosine_bounded=True))
    assert jnp.allclose(out3, ref1, rtol=1e-5, atol=1e-5), (out3, ref1)

    print("KERNEL_OK")
</pallas_src>

<mosaic_0001>
module attributes {stable_mosaic.version = 11 : i64} {
  func.func @_he_loss_kernel(%arg0: i32, %arg1: i32, %arg2: memref<3xf32, #tpu.memory_space<smem>>, %arg3: memref<1xi32, #tpu.memory_space<smem>>, %arg4: memref<10x128xf32, #tpu.memory_space<vmem>>, %arg5: memref<1x128xi32, #tpu.memory_space<vmem>>, %arg6: memref<1x8x128xf32, #tpu.memory_space<vmem>>, %arg7: memref<1x128xf32, #tpu.memory_space<vmem>>) attributes {dimension_semantics = [#tpu.dimension_semantics<parallel>, #tpu.dimension_semantics<arbitrary>], iteration_bounds = array<i64: 1, 1>, scalar_prefetch = 0 : i64, scratch_operands = 1 : i64, tpu.core_type = #tpu.core_type<tc>, window_params = [{transform_indices = @transform_0, window_bounds = array<i64: 3>}, {transform_indices = @transform_1, window_bounds = array<i64: 1>}, {transform_indices = @transform_2, window_bounds = array<i64: 10, 128>}, {transform_indices = @transform_3, window_bounds = array<i64: 1, 128>}, {transform_indices = @transform_4, window_bounds = array<i64: 1, 8, 128>}]} {
    %c0_i32 = arith.constant 0 : i32
    %0 = arith.cmpi eq, %arg1, %c0_i32 : i32
    %1 = arith.extui %0 : i1 to i32
    %c0_i32_0 = arith.constant 0 : i32
    %2 = arith.cmpi ne, %1, %c0_i32_0 : i32
    scf.if %2 {
      %cst_17 = arith.constant 0.000000e+00 : f32
      %54 = vector.broadcast %cst_17 : f32 to vector<1x128xf32>
      %c0_18 = arith.constant 0 : index
      %c0_19 = arith.constant 0 : index
      %55 = vector.load %arg7[%c0_18, %c0_19] : memref<1x128xf32, #tpu.memory_space<vmem>>, vector<1x128xf32>
      tpu.vector_store %arg7[%c0_18, %c0_19], %54 {strides = array<i32>} : memref<1x128xf32, #tpu.memory_space<vmem>>, vector<1x128xf32>,
    } else {
    }
    %c0 = arith.constant 0 : index
    %3 = memref.load %arg2[%c0] : memref<3xf32, #tpu.memory_space<smem>>
    %c1 = arith.constant 1 : index
    %4 = memref.load %arg2[%c1] : memref<3xf32, #tpu.memory_space<smem>>
    %c2 = arith.constant 2 : index
    %5 = memref.load %arg2[%c2] : memref<3xf32, #tpu.memory_space<smem>>
    %c0_1 = arith.constant 0 : index
    %c0_2 = arith.constant 0 : index
    %6 = vector.load %arg4[%c0_1, %c0_2] : memref<10x128xf32, #tpu.memory_space<vmem>>, vector<10x128xf32>
    %c0_3 = arith.constant 0 : index
    %c0_4 = arith.constant 0 : index
    %7 = vector.load %arg5[%c0_3, %c0_4] : memref<1x128xi32, #tpu.memory_space<vmem>>, vector<1x128xi32>
    %c1_i32 = arith.constant 1 : i32
    %8 = arith.muli %arg0, %c1_i32 : i32
    %9 = arith.addi %8, %arg1 : i32
    %c128_i32 = arith.constant 128 : i32
    %10 = arith.muli %9, %c128_i32 : i32
    %11 = tpu.iota {dimensions = array<i32: 1>} : vector<1x128xi32>
    %12 = vector.broadcast %10 : i32 to vector<1x128xi32>
    %13 = arith.addi %12, %11 : vector<1x128xi32>
    %c0_5 = arith.constant 0 : index
    %14 = memref.load %arg3[%c0_5] : memref<1xi32, #tpu.memory_space<smem>>
    %15 = vector.broadcast %14 : i32 to vector<1x128xi32>
    %16 = arith.cmpi slt, %13, %15 : vector<1x128xi32>
    %17 = tpu.iota {dimensions = array<i32: 0>} : vector<10x128xi32>
    %18 = vector.broadcast %7 : vector<1x128xi32> to vector<10x128xi32>
    %19 = arith.cmpi eq, %17, %18 : vector<10x128xi32>
    %20 = vector.broadcast %4 : f32 to vector<10x128xf32>
    %21 = arith.subf %6, %20 : vector<10x128xf32>
    %22 = arith.select %19, %21, %6 : vector<10x128xi1>, vector<10x128xf32>
    %23 = vector.broadcast %3 : f32 to vector<10x128xf32>
    %24 = arith.mulf %22, %23 : vector<10x128xf32>
    %cst = arith.constant dense<0xFF800000> : vector<128xf32>
    %25 = vector.multi_reduction <maximumf>, %24, %cst [0] : vector<10x128xf32> to vector<128xf32>
    %26 = vector.shape_cast %25 : vector<128xf32> to vector<1x128xf32>
    %27 = vector.broadcast %26 : vector<1x128xf32> to vector<10x128xf32>
    %28 = arith.subf %24, %27 : vector<10x128xf32>
    %29 = math.exp %28 : vector<10x128xf32>
    %cst_6 = arith.constant dense<0.000000e+00> : vector<128xf32>
    %30 = vector.multi_reduction <add>, %29, %cst_6 [0] : vector<10x128xf32> to vector<128xf32>
    %31 = vector.shape_cast %30 : vector<128xf32> to vector<1x128xf32>
    %32 = math.log %31 : vector<1x128xf32>
    %33 = arith.addf %26, %32 : vector<1x128xf32>
    %cst_7 = arith.constant 0.000000e+00 : f32
    %34 = vector.broadcast %cst_7 : f32 to vector<10x128xf32>
    %35 = arith.select %19, %6, %34 : vector<10x128xi1>, vector<10x128xf32>
    %cst_8 = arith.constant dense<0.000000e+00> : vector<128xf32>
    %36 = vector.multi_reduction <add>, %35, %cst_8 [0] : vector<10x128xf32> to vector<128xf32>
    %37 = vector.shape_cast %36 : vector<128xf32> to vector<1x128xf32>
    %cst_9 = arith.constant 1.000000e+00 : f32
    %38 = arith.addf %cst_9, %5 : f32
    %39 = arith.mulf %3, %38 : f32
    %40 = arith.mulf %3, %4 : f32
    %41 = vector.broadcast %39 : f32 to vector<1x128xf32>
    %42 = arith.mulf %41, %37 : vector<1x128xf32>
    %43 = arith.subf %33, %42 : vector<1x128xf32>
    %44 = vector.broadcast %40 : f32 to vector<1x128xf32>
    %45 = arith.addf %43, %44 : vector<1x128xf32>
    %c0_10 = arith.constant 0 : index
    %c0_11 = arith.constant 0 : index
    %46 = vector.load %arg7[%c0_10, %c0_11] : memref<1x128xf32, #tpu.memory_space<vmem>>, vector<1x128xf32>
    %cst_12 = arith.constant 0.000000e+00 : f32
    %47 = vector.broadcast %cst_12 : f32 to vector<1x128xf32>
    %48 = arith.select %16, %45, %47 : vector<1x128xi1>, vector<1x128xf32>
    %49 = arith.addf %46, %48 : vector<1x128xf32>
    %c0_13 = arith.constant 0 : index
    %c0_14 = arith.constant 0 : index
    %50 = vector.load %arg7[%c0_13, %c0_14] : memref<1x128xf32, #tpu.memory_space<vmem>>, vector<1x128xf32>
    tpu.vector_store %arg7[%c0_13, %c0_14], %49 {strides = array<i32>} : memref<1x128xf32, #tpu.memory_space<vmem>>, vector<1x128xf32>,
    %c0_i32_15 = arith.constant 0 : i32
    %51 = arith.cmpi eq, %arg1, %c0_i32_15 : i32
    %52 = arith.extui %51 : i1 to i32
    %c0_i32_16 = arith.constant 0 : i32
    %53 = arith.cmpi ne, %52, %c0_i32_16 : i32
    scf.if %53 {
      %c0_17 = arith.constant 0 : index
      %c0_18 = arith.constant 0 : index
      %54 = vector.load %arg7[%c0_17, %c0_18] : memref<1x128xf32, #tpu.memory_space<vmem>>, vector<1x128xf32>
      %55 = vector.shape_cast %54 : vector<1x128xf32> to vector<1x1x128xf32>
      %cst_19 = arith.constant dense<0.000000e+00> : vector<1xf32>
      %56 = vector.multi_reduction <add>, %55, %cst_19 [1, 2] : vector<1x1x128xf32> to vector<1xf32>
      %57 = vector.shape_cast %56 : vector<1xf32> to vector<1x1x1xf32>
      %58 = vector.extract %57[0, 0, 0] : f32 from vector<1x1x1xf32>
      %59 = vector.broadcast %58 : f32 to vector<1x8x128xf32>
      %c0_20 = arith.constant 0 : index
      %c0_21 = arith.constant 0 : index
      %c0_22 = arith.constant 0 : index
      %60 = vector.load %arg6[%c0_20, %c0_21, %c0_22] : memref<1x8x128xf32, #tpu.memory_space<vmem>>, vector<1x8x128xf32>
      tpu.vector_store %arg6[%c0_20, %c0_21, %c0_22], %59 {strides = array<i32>} : memref<1x8x128xf32, #tpu.memory_space<vmem>>, vector<1x8x128xf32>,
    } else {
    }
    return
  }
  func.func @transform_0(%arg0: i32, %arg1: i32) -> i32 {
    %c0_i32 = arith.constant 0 : i32
    %c0_i32_0 = arith.constant 0 : i32
    return %c0_i32 : i32
  }
  func.func @transform_1(%arg0: i32, %arg1: i32) -> i32 {
    %c0_i32 = arith.constant 0 : i32
    %c0_i32_0 = arith.constant 0 : i32
    return %c0_i32 : i32
  }
  func.func @transform_2(%arg0: i32, %arg1: i32) -> (i32, i32) {
    %c1_i32 = arith.constant 1 : i32
    %0 = arith.muli %arg0, %c1_i32 : i32
    %1 = arith.addi %0, %arg1 : i32
    %c0_i32 = arith.constant 0 : i32
    %c0_i32_0 = arith.constant 0 : i32
    return %c0_i32, %1 : i32, i32
  }
  func.func @transform_3(%arg0: i32, %arg1: i32) -> (i32, i32) {
    %c1_i32 = arith.constant 1 : i32
    %0 = arith.muli %arg0, %c1_i32 : i32
    %1 = arith.addi %0, %arg1 : i32
    %c0_i32 = arith.constant 0 : i32
    %c0_i32_0 = arith.constant 0 : i32
    return %c0_i32, %1 : i32, i32
  }
  func.func @transform_4(%arg0: i32, %arg1: i32) -> (i32, i32, i32) {
    %c0_i32 = arith.constant 0 : i32
    %c0_i32_0 = arith.constant 0 : i32
    %c0_i32_1 = arith.constant 0 : i32
    return %arg0, %c0_i32, %c0_i32_0 : i32, i32, i32
  }
}

</mosaic_0001>

<bundles_post_ra>
// kernel: tpu_custom_call.1
= control target key start
LH: loop header
LB: loop body
LE: loop exit
PB: predicated region body
PF: predicated region fallthrough
CT: control target
= control target key end

     0   :  { %10 = vsyncpa [#allocation6], 0  ;;  %s315_s0 = inlined_call_operand.vmem [shape: f32[3], index: 0, kind: input, shape index: {}]   ;;  %s316_s1 = inlined_call_operand.<no memory space> [shape: s32[1], index: 1, kind: input, shape index: {}]   ;;  %s317_s2 = inlined_call_operand.vmem [shape: f32[10,8], index: 2, kind: input, shape index: {}]   ;;  %s318_s3 = inlined_call_operand.vmem [shape: s32[1,8], index: 3, kind: input, shape index: {}]   ;;  %s319_s4 = inlined_call_operand.hbm [shape: f32[1,8,128], index: 4, kind: output, shape index: {}]  }
   0x1   :  { %11 = vsyncpa [#allocation5], 0  ;;  %s18_s17 = sshll.u32 %s315_s0, 4  ;;  %s19_s17 = int_to_ptr.vmem [resolvable:$true] %s18_s17 }
   0x2   :  { %s203_s18 = scalar_lea.vmem %s19_s17, 16  ;;  %p208_p1 = scmp.lt.s32.totalorder %s19_s17, %s19_s17 }
   0x3   :  { %p204_p0 = scmp.ne.s32.totalorder %s19_s17, %s203_s18  ;;  %p209_p2 = scmp.lt.s32.totalorder %s203_s18, %s203_s18 }
   0x5   :  { %p210_p3 = por %p209_p2, %p208_p1 }
   0x7   :  { %p211_p4 = pnand %p210_p3, %p204_p0 }
   0x9   :  { %214 = shalt.err (!%p211_p4)
}
   0xa   :  { %s241_s19 = smov [#allocation4]  }
   0xb   :  { %21 = dma.vmem_to_smem %s19_s17, 16, %s241_s19, [#allocation6]  }
   0xc   :  { %237 = dma.done.wait [#allocation6], 16  }
   0xd   :  { %238 = vsyncadd [#allocation6], 4294967280 }
   0xe   :  { %42 = sfence }
   0xf   :  { %s272_s20 = sld [smem:[#allocation4]]  ;;  %s274_s21 = sld [smem:[#allocation4 + $0x1]]  ;;  %v76_v0 = vlaneseq  ;;  %v242_v1 = vmov 0.0   ;;  %v191_v3 = vld [vmem:[%s318_s3] ss:$0 sm:$0xff]  ;;  %vm100_vm2 = vcmask 1041408   ;;  %v81_v52 = vstv %s316_s1 }
  0x10   :  { %67 = vst [vmem:[#allocation2] sm:$0x1] %v242_v1  ;;  %v71_v4 = vld [vmem:[%s317_s2] sm:$0xff]  ;;  %v72_v5 = vld [vmem:[%s317_s2 + $0x8] sm:$0x3]  ;;  %s190_s2 = sld [smem:[#allocation4 + $0x2]] }
  0x11   :  { %v84_v2 = vshrl.u32 %v76_v0, 7  ;;  %v77_v51 = vand.u32 127, %v76_v0  ;;  %vm152_vm4 = vcmask 1040384   ;;  %s243_s1 = smov [#allocation7]  }
  0x12   :  { %s171_s5 = sshll.u32 %s243_s1, 4  ;;  %s172_s5 = int_to_ptr.vmem [resolvable:$true] %s171_s5 }
  0x13   :  { %v85_v6 = vadd.s32 8, %v84_v2  ;;  %vm90_vm0 = vcmp.eq.s32.totalorder %v84_v2, %v191_v3  ;;  %vm82_vm3 = vcmp.lt.s32.totalorder %v77_v51, %v81_v52  ;;  %s215_s7 = scalar_lea.vmem %s172_s5, 128  ;;  %p220_p6 = scmp.lt.s32.totalorder %s172_s5, %s172_s5 }
  0x14   :  { %v126_v28 = vsel %vm90_vm0, %v71_v4, 0.0  ;;  %p216_p5 = scmp.ne.s32.totalorder %s172_s5, %s215_s7  ;;  %p221_p7 = scmp.lt.s32.totalorder %s215_s7, %s215_s7 }
  0x15   :  { %vm91_vm1 = vcmp.eq.s32.totalorder %v85_v6, %v191_v3  ;;  %v92_v7 = vstv %s274_s21  ;;  %s138_s27 = smul.f32 %s274_s21, %s272_s20  ;;  %v97_v10 = vstv %s272_s20 }
  0x16   :  { %v93_v8 = vsub.f32 %v71_v4, %v92_v7  ;;  %v94_v9 = vsub.f32 %v72_v5, %v92_v7  ;;  %v127_v27 = vsel %vm91_vm1, %v72_v5, 0.0  ;;  %s136_s3 = sadd.f32 1.0, %s190_s2  ;;  %p222_p8 = por %p221_p7, %p220_p6 }
  0x17   :  { %v128_v29 = vsel %vm100_vm2, %v127_v27, 0.0  ;;  %v142_v54 = vstv %s138_s27  ;;  %v144_v57 = vld [vmem:[#allocation2] sm:$0x1] }
  0x18   :  { %v95_v11 = vsel %vm90_vm0, %v93_v8, %v71_v4  ;;  %v96_v12 = vsel %vm91_vm1, %v94_v9, %v72_v5  ;;  %v129_v31 = vadd.f32 %v128_v29, %v126_v28  ;;  %s137_s28 = smul.f32 %s136_s3, %s272_s20  ;;  %p223_p9 = pnand %p222_p8, %p216_p5 }
  0x19   :  { %v98_v13 = vmul.f32 %v97_v10, %v95_v11  ;;  %v99_v14 = vmul.f32 %v97_v10, %v96_v12 }
  0x1a   :  { %v130_v35 = vrot.slane %v129_v31, 4  ;;  %v139_v47 = vstv %s137_s28 }
  0x1b   :  { %v101_v15 = vsel %vm100_vm2, %v99_v14, -inf }
  0x1c   :  { %v102_v16 = vmax.f32 %v98_v13, %v101_v15  ;;  %v131_v38 = vadd.f32 %v130_v35, %v129_v31 }
  0x1e   :  { %v103_v17 = vrot.slane %v102_v16, 4  ;;  %v132_v41 = vrot.slane %v131_v38, 2 }
  0x20   :  { %v104_v18 = vmax.f32 %v102_v16, %v103_v17  ;;  %v133_v44 = vadd.f32 %v132_v41, %v131_v38 }
  0x22   :  { %v105_v19 = vrot.slane %v104_v18, 2  ;;  %v134_v45 = vrot.slane %v133_v44, 1 }
  0x24   :  { %v106_v20 = vmax.f32 %v104_v18, %v105_v19  ;;  %v135_v46 = vadd.f32 %v134_v45, %v133_v44 }
  0x26   :  { %v107_v21 = vrot.slane %v106_v20, 1  ;;  %v140_v50 = vmul.f32 %v139_v47, %v135_v46 }
  0x28   :  { %v108_v22 = vmax.f32 %v106_v20, %v107_v21 }
  0x2a   :  { %v109_v23 = vsub.f32 %v98_v13, %v108_v22  ;;  %v110_v24 = vsub.f32 %v99_v14, %v108_v22 }
  0x2c   :  { %v111_v25 = vmul.f32 1.442695, %v109_v23  ;;  %v113_v26 = vmul.f32 1.442695, %v110_v24 }
  0x2e   :  { %197 = vpow2.f32 %v111_v25 }
  0x2f   :  { %199 = vpow2.f32 %v113_v26 }
  0x38   :  { %v198_v30 = vpop.eup %197 }
  0x39   :  { %v200_v32 = vpop.eup %199 }
  0x3a   :  { %v115_v33 = vsel %vm100_vm2, %v200_v32, 0.0 }
  0x3b   :  { %v116_v34 = vadd.f32 %v198_v30, %v115_v33 }
  0x3d   :  { %v117_v36 = vrot.slane %v116_v34, 4 }
  0x3f   :  { %v118_v37 = vadd.f32 %v117_v36, %v116_v34 }
  0x41   :  { %v119_v39 = vrot.slane %v118_v37, 2 }
  0x43   :  { %v120_v40 = vadd.f32 %v119_v39, %v118_v37 }
  0x45   :  { %v121_v42 = vrot.slane %v120_v40, 1 }
  0x47   :  { %v122_v43 = vadd.f32 %v121_v42, %v120_v40 }
  0x49   :  { %201 = vlog2.f32 %v122_v43 }
  0x53   :  { %v202_v48 = vpop.eup %201 }
  0x54   :  { %v124_v49 = vmul.f32 0.6931472, %v202_v48 }
  0x56   :  { %v125_v53 = vadd.f32 %v124_v49, %v108_v22 }
  0x58   :  { %v141_v55 = vsub.f32 %v125_v53, %v140_v50 }
  0x5a   :  { %v143_v56 = vadd.f32 %v142_v54, %v141_v55 }
  0x5c   :  { %v145_v58 = vsel %vm82_vm3, %v143_v56, 0.0 }
  0x5d   :  { %v146_v59 = vadd.f32 %v145_v58, %v144_v57 }
  0x5f   :  { %147 = vst [vmem:[#allocation2] sm:$0x1] %v146_v59 }
  0x66   :  { %v151_v60 = vld [vmem:[#allocation2] sm:$0x1] }
  0x67   :  { %v153_v61 = vsel %vm152_vm4, %v151_v60, 0.0 }
  0x68   :  { %154 = vadd.xlane.f32.xlu0 %v153_v61 }
  0xf5   :  { %v155_v62 = vpop.xlane.xlu0 %154 }
  0xf6   :  { %v156_v63 = vrot.slane %v155_v62, 4 }
  0xf8   :  { %v157_v0 = vadd.f32 %v156_v63, %v155_v62 }
  0xfa   :  { %v158_v1 = vrot.slane %v157_v0, 2 }
  0xfc   :  { %v159_v2 = vadd.f32 %v158_v1, %v157_v0 }
  0xfe   :  { %v160_v3 = vrot.slane %v159_v2, 1 }
 0x100   :  { %v161_v4 = vadd.f32 %v160_v3, %v159_v2 }
 0x102   :  { %192 = vpush %v161_v4 }
 0x133   :  { %s193_s6 = spop %192 }
 0x134   :  { %v163_v5 = vstv %s193_s6 }
 0x135   :  { %164 = vst [vmem:[#allocation7] sm:$0xff] %v163_v5 }
 0x136   :  { %226 = shalt.err (!%p223_p9)
}
 0x137   :  { %s227_s10 = scalar_lea.hbm %s319_s4, 128 }
 0x138   :  { %p228_p10 = scmp.ne.s32.totalorder %s319_s4, %s227_s10  ;;  %p231_p11 = scmp.lt.u32.totalorder %s227_s10, %s319_s4 }
 0x13a   :  { %p233_p12 = pnand %p231_p11, %p228_p10 }
 0x13c   :  { %236 = shalt.err (!%p233_p12)
}
 0x13d   :  { %174 = dma.vmem_to_hbm [thread:$0]  %s172_s5, 128, %s319_s4, [#allocation5]  }
 0x13e   :  { %239 = dma.done.wait [#allocation5], 128  }
 0x13f   :  { %240 = vsyncadd [#allocation5], 4294967168 }
 0x140   :  { %178 = vsyncpa [#allocation5], 1 }
 0x141   :  { %179 = vsyncpa [#allocation6], 1 }

</bundles_post_ra>
